<compile_context>
chip_gen: v7x
topology: tpu7x:2x2x1
jax: 0.10.0
libtpu: 0.0.40
codegen_flags: <defaults>
</compile_context>

<pallas_src>
import jax
import jax.numpy as jnp
import numpy as np
from jax.experimental import pallas as pl
from jax.experimental.pallas import tpu as pltpu


def dam_kernel(x_ref, w1_ref, aux_ref, out_ref):
    # x_ref:   (TM, N)  tile of flattened inputs, SOURCE dtype (cast in-kernel)
    # w1_ref:  (N, H)   first Linear weight, (in, out), matmul dtype (f32/bf16)
    # aux_ref: (3, H)   row 0 = b1, row 1 = w2[:,0]-w2[:,1],
    #                   row 2 = [b2[0]-b2[1], 0, 0, ...]
    # out_ref: (TM, 2)  softmax probabilities (pi, pi_2) per row

    # In-kernel dtype convert (no-op when dtypes already match) so the wrapper
    # never adds an extra HBM read/write pass just to change x's dtype.
    x = x_ref[...].astype(w1_ref.dtype)

    # First Linear on the MXU, f32 accumulation; bias + ReLU on the VPU.
    h = jnp.dot(x, w1_ref[...], preferred_element_type=jnp.float32)
    h = jnp.maximum(h + aux_ref[0:1, :], 0.0)

    # Second Linear + 2-way softmax: softmax over 2 logits depends only on the
    # logit difference d = z0 - z1, so compute it with a VPU broadcast-multiply
    # and an XLU lane reduction (no second MXU round trip).
    d = (jnp.sum(h * aux_ref[1:2, :], axis=-1, keepdims=True)
         + aux_ref[2:3, 0:1])                                   # (TM, 1)

    # Numerically stable 2-way softmax (sigmoid of the difference):
    #   pi = 1 / (1 + exp(-d)),  pi_2 = exp(-d) / (1 + exp(-d))
    e = jnp.exp(-jnp.abs(d))                                    # EUP exp, <= 1
    inv = pl.reciprocal(1.0 + e, approx=False)                  # exact: 1e-5 tol
    p_hi = inv            # probability of the larger logit
    p_lo = e * inv        # probability of the smaller logit
    pos = d >= 0.0
    p_first = jnp.where(pos, p_hi, p_lo)                        # pi     (TM, 1)
    p_second = jnp.where(pos, p_lo, p_hi)                       # pi_2   (TM, 1)

    # Single store for the (TM, 2) tile: select by lane index instead of two
    # separate 1-lane masked stores.
    col = jax.lax.broadcasted_iota(jnp.int32, out_ref.shape, 1)
    out_ref[...] = jnp.where(col == 0, p_first, p_second)


def _round_up(x, m):
    return (x + m - 1) // m * m


def prepare_dam_params(w1, b1, w2, b2, *, matmul_dtype=jnp.float32):
    """Cast / reshape / fold parameters ONCE (hoisted out of per-call wrapper).

    w1: (in_channels, hidden)   b1: (hidden,)   w2: (hidden, 2)   b2: (2,)

    Returns:
      w1p: (N, H) matmul-dtype weight (bf16 fast path on v6e/v7x if requested)
      aux: (3, H) f32 -- row0 = b1, row1 = w2[:,0]-w2[:,1], row2 = [b2d, 0...]
    """
    w1f = jnp.asarray(w1, jnp.float32)
    hid = w1f.shape[1]
    w1p = w1f.astype(matmul_dtype)
    b1f = jnp.asarray(b1, jnp.float32).reshape(1, hid)
    w2f = jnp.asarray(w2, jnp.float32)
    b2f = jnp.asarray(b2, jnp.float32)
    w2d = (w2f[:, 0] - w2f[:, 1]).reshape(1, hid)               # logit-diff weight
    b2d_row = jnp.zeros((1, hid), jnp.float32).at[0, 0].set(b2f[0] - b2f[1])
    aux = jnp.concatenate([b1f, w2d, b2d_row], axis=0)          # (3, H)
    return w1p, aux


def dam_forward_batched(xb, params, *, block_b=512):
    """Run B independent DAM evaluations in one pallas_call.

    xb: (B, in_channels) flattened inputs (any float dtype; cast in-kernel).
    Returns (B, 2) probabilities, f32.
    """
    w1p, aux = params
    n, hid = w1p.shape
    xb = jnp.asarray(xb)
    b = xb.shape[0]
    xb = xb.reshape(b, n)                     # keep source dtype; cast in-kernel

    # Batch tile: as large as possible (kernel is HBM/overhead bound), but keep
    # the grid at >= 2 steps when B allows so v7x's two TensorCores both work.
    tm = min(block_b, _round_up(max(pl.cdiv(b, 2), 1), 8))
    b_pad = _round_up(b, tm)
    if b_pad != b:
        xb = jnp.pad(xb, ((0, b_pad - b), (0, 0)))
    grid = (b_pad // tm,)

    cost = pl.CostEstimate(
        flops=int(2 * b_pad * n * hid + 6 * b_pad * hid),
        transcendentals=int(b_pad),
        bytes_accessed=int(xb.size * xb.dtype.itemsize
                           + w1p.size * w1p.dtype.itemsize
                           + aux.size * 4
                           + b_pad * 2 * 4),
    )

    probs = pl.pallas_call(
        dam_kernel,
        out_shape=jax.ShapeDtypeStruct((b_pad, 2), jnp.float32),
        grid=grid,
        in_specs=[
            pl.BlockSpec((tm, n), lambda i: (i, 0)),      # x: tiled over batch
            pl.BlockSpec((n, hid), lambda i: (0, 0)),     # w1: resident
            pl.BlockSpec((3, hid), lambda i: (0, 0)),     # folded b1 / w2d / b2d
        ],
        out_specs=pl.BlockSpec((tm, 2), lambda i: (i, 0)),
        compiler_params=pltpu.CompilerParams(
            dimension_semantics=("parallel",),            # megacore split on v7x
            vmem_limit_bytes=8 * 1024 * 1024,             # tiny working set
        ),
        cost_estimate=cost,
    )(xb, w1p, aux)

    return probs[:b]


def dynamic_attention_module(x, params):
    """Faithful Dynamic_Attention_Module.forward: flatten the whole tensor to a
    single vector, run MLP + 2-way softmax, return scalars (pi, pi_2).

    Note: at B=1 the Pallas launch cost dwarfs the ~10 KFLOP of work; batch
    multiple module evaluations through dam_forward_batched when possible.
    """
    n = params[0].shape[0]
    x2d = jnp.asarray(x).reshape(1, n)
    probs = dam_forward_batched(x2d, params)
    return probs[0, 0], probs[0, 1]


# ----------------------------- float64 references -----------------------------

def reference_batched(xb, w1, b1, w2, b2):
    xb = np.asarray(xb, np.float64).reshape(np.asarray(xb).shape[0], -1)
    w1 = np.asarray(w1, np.float64)
    b1 = np.asarray(b1, np.float64)
    w2 = np.asarray(w2, np.float64)
    b2 = np.asarray(b2, np.float64)
    h = np.maximum(xb @ w1 + b1, 0.0)
    logits = h @ w2 + b2
    e = np.exp(logits - logits.max(axis=-1, keepdims=True))
    return e / e.sum(axis=-1, keepdims=True)


def reference_single(x, w1, b1, w2, b2):
    p = reference_batched(np.asarray(x).reshape(1, -1), w1, b1, w2, b2)
    return p[0, 0], p[0, 1]


if __name__ == "__main__":
    # Module config: in_channels = prod(input shape), rate = 5.
    in_channels = 160
    rate = 5
    hidden = in_channels // rate  # 32

    key = jax.random.PRNGKey(0)
    kx, kw1, kb1, kw2, kb2, kxb = jax.random.split(key, 6)

    # Input tensor whose total element count equals in_channels: (2, 4, 4, 5) -> 160.
    x = jax.random.normal(kx, (2, 4, 4, 5), dtype=jnp.float32)

    # nn.Linear-style uniform(-1/sqrt(fan_in), 1/sqrt(fan_in)) init.
    bound1 = 1.0 / np.sqrt(in_channels)
    w1 = jax.random.uniform(kw1, (in_channels, hidden), jnp.float32, -bound1, bound1)
    b1 = jax.random.uniform(kb1, (hidden,), jnp.float32, -bound1, bound1)
    bound2 = 1.0 / np.sqrt(hidden)
    w2 = jax.random.uniform(kw2, (hidden, 2), jnp.float32, -bound2, bound2)
    b2 = jax.random.uniform(kb2, (2,), jnp.float32, -bound2, bound2)

    # 1) Module-faithful forward (single flattened vector), f32 MXU operands.
    params_f32 = prepare_dam_params(w1, b1, w2, b2, matmul_dtype=jnp.float32)
    pi, pi_2 = dynamic_attention_module(x, params_f32)
    jax.block_until_ready((pi, pi_2))
    pi_ref, pi2_ref = reference_single(x, w1, b1, w2, b2)
    np.testing.assert_allclose(np.asarray(pi), pi_ref, rtol=1e-5, atol=1e-5)
    np.testing.assert_allclose(np.asarray(pi_2), pi2_ref, rtol=1e-5, atol=1e-5)

    # 2) Batched path: 256 independent DAM evaluations in one call.
    #    TM clamps to 128 here so the parallel grid has 2 steps (both v7x TCs).
    xb = jax.random.normal(kxb, (256, in_channels), dtype=jnp.float32)
    probs = dam_forward_batched(xb, params_f32)
    jax.block_until_ready(probs)
    probs_ref = reference_batched(xb, w1, b1, w2, b2)
    np.testing.assert_allclose(np.asarray(probs), probs_ref, rtol=1e-5, atol=1e-5)

    # 3) Same batch with bf16 MXU weights; x stays f32 in HBM and is cast to
    #    bf16 INSIDE the kernel (no extra wrapper-side HBM pass); f32 accumulation.
    params_bf16 = prepare_dam_params(w1, b1, w2, b2, matmul_dtype=jnp.bfloat16)
    probs_bf16 = dam_forward_batched(xb, params_bf16)
    jax.block_until_ready(probs_bf16)
    np.testing.assert_allclose(np.asarray(probs_bf16), probs_ref, rtol=0.0, atol=3e-2)

    # 4) Larger batch exercising the 512-row tiles (grid of 4 parallel steps).
    xb_big = jax.random.normal(kxb, (2048, in_channels), dtype=jnp.float32)
    probs_big = dam_forward_batched(xb_big, params_f32)
    jax.block_until_ready(probs_big)
    probs_big_ref = reference_batched(xb_big, w1, b1, w2, b2)
    np.testing.assert_allclose(np.asarray(probs_big), probs_big_ref, rtol=1e-5, atol=1e-5)

    print("KERNEL_OK")
</pallas_src>

<mosaic_0001>
module attributes {stable_mosaic.version = 11 : i64} {
  func.func @dam_kernel(%arg0: i32, %arg1: memref<8x160xf32, #tpu.memory_space<vmem>>, %arg2: memref<160x32xf32, #tpu.memory_space<vmem>>, %arg3: memref<3x32xf32, #tpu.memory_space<vmem>>, %arg4: memref<8x2xf32, #tpu.memory_space<vmem>>) attributes {dimension_semantics = [#tpu.dimension_semantics<parallel>], iteration_bounds = array<i64: 1>, scalar_prefetch = 0 : i64, scratch_operands = 0 : i64, tpu.core_type = #tpu.core_type<tc>, window_params = [{transform_indices = @transform_0, window_bounds = array<i64: 8, 160>}, {pipeline_mode = #tpu.pipeline_mode<synchronous>, transform_indices = @transform_1, window_bounds = array<i64: 160, 32>}, {pipeline_mode = #tpu.pipeline_mode<synchronous>, transform_indices = @transform_2, window_bounds = array<i64: 3, 32>}, {transform_indices = @transform_3, window_bounds = array<i64: 8, 2>}]} {
    %c0 = arith.constant 0 : index
    %c0_0 = arith.constant 0 : index
    %0 = vector.load %arg1[%c0, %c0_0] : memref<8x160xf32, #tpu.memory_space<vmem>>, vector<8x160xf32>
    %c0_1 = arith.constant 0 : index
    %c0_2 = arith.constant 0 : index
    %1 = vector.load %arg2[%c0_1, %c0_2] : memref<160x32xf32, #tpu.memory_space<vmem>>, vector<160x32xf32>
    %cst = arith.constant dense<0.000000e+00> : vector<8x32xf32>
    %2 = tpu.matmul %0, %1, %cst {dimension_numbers = #tpu.dot_dimension_numbers<[1], [0], [0], [1], [0, 0, 1, 1], [], []>} : vector<8x160xf32>, vector<160x32xf32>, vector<8x32xf32> -> vector<8x32xf32>
    %c0_3 = arith.constant 0 : index
    %c0_4 = arith.constant 0 : index
    %3 = vector.load %arg3[%c0_3, %c0_4] : memref<3x32xf32, #tpu.memory_space<vmem>>, vector<1x32xf32>
    %4 = vector.broadcast %3 : vector<1x32xf32> to vector<8x32xf32>
    %5 = arith.addf %2, %4 : vector<8x32xf32>
    %cst_5 = arith.constant 0.000000e+00 : f32
    %6 = vector.broadcast %cst_5 : f32 to vector<8x32xf32>
    %7 = arith.maximumf %5, %6 : vector<8x32xf32>
    %c1 = arith.constant 1 : index
    %c0_6 = arith.constant 0 : index
    %8 = vector.load %arg3[%c1, %c0_6] : memref<3x32xf32, #tpu.memory_space<vmem>>, vector<1x32xf32>
    %9 = vector.broadcast %8 : vector<1x32xf32> to vector<8x32xf32>
    %10 = arith.mulf %7, %9 : vector<8x32xf32>
    %cst_7 = arith.constant dense<0.000000e+00> : vector<8xf32>
    %11 = vector.multi_reduction <add>, %10, %cst_7 [1] : vector<8x32xf32> to vector<8xf32>
    %12 = vector.shape_cast %11 : vector<8xf32> to vector<8x1xf32>
    %c2 = arith.constant 2 : index
    %c0_8 = arith.constant 0 : index
    %13 = vector.load %arg3[%c2, %c0_8] : memref<3x32xf32, #tpu.memory_space<vmem>>, vector<1x1xf32>
    %14 = vector.broadcast %13 : vector<1x1xf32> to vector<8x1xf32>
    %15 = arith.addf %12, %14 : vector<8x1xf32>
    %16 = math.absf %15 : vector<8x1xf32>
    %cst_9 = arith.constant 0.000000e+00 : f32
    %17 = vector.broadcast %cst_9 : f32 to vector<8x1xf32>
    %18 = arith.subf %17, %16 : vector<8x1xf32>
    %19 = math.exp %18 : vector<8x1xf32>
    %cst_10 = arith.constant 1.000000e+00 : f32
    %20 = vector.broadcast %cst_10 : f32 to vector<8x1xf32>
    %21 = arith.addf %20, %19 : vector<8x1xf32>
    %22 = tpu.reciprocal %21 : vector<8x1xf32> -> vector<8x1xf32>
    %23 = arith.mulf %19, %22 : vector<8x1xf32>
    %cst_11 = arith.constant 0.000000e+00 : f32
    %24 = vector.broadcast %cst_11 : f32 to vector<8x1xf32>
    %25 = arith.cmpf oge, %15, %24 : vector<8x1xf32>
    %26 = arith.select %25, %22, %23 : vector<8x1xi1>, vector<8x1xf32>
    %27 = arith.select %25, %23, %22 : vector<8x1xi1>, vector<8x1xf32>
    %28 = tpu.iota {dimensions = array<i32: 1>} : vector<8x2xi32>
    %c0_i32 = arith.constant 0 : i32
    %29 = vector.broadcast %c0_i32 : i32 to vector<8x2xi32>
    %30 = arith.cmpi eq, %28, %29 : vector<8x2xi32>
    %31 = vector.shape_cast %26 : vector<8x1xf32> to vector<8x1xf32>
    %32 = vector.broadcast %31 : vector<8x1xf32> to vector<8x2xf32>
    %33 = vector.shape_cast %27 : vector<8x1xf32> to vector<8x1xf32>
    %34 = vector.broadcast %33 : vector<8x1xf32> to vector<8x2xf32>
    %35 = arith.select %30, %32, %34 : vector<8x2xi1>, vector<8x2xf32>
    %c0_12 = arith.constant 0 : index
    %c0_13 = arith.constant 0 : index
    %36 = vector.load %arg4[%c0_12, %c0_13] : memref<8x2xf32, #tpu.memory_space<vmem>>, vector<8x2xf32>
    tpu.vector_store %arg4[%c0_12, %c0_13], %35 {strides = array<i32>} : memref<8x2xf32, #tpu.memory_space<vmem>>, vector<8x2xf32>,
    return
  }
  func.func @transform_0(%arg0: i32) -> (i32, i32) {
    %c0_i32 = arith.constant 0 : i32
    %c0_i32_0 = arith.constant 0 : i32
    return %arg0, %c0_i32 : i32, i32
  }
  func.func @transform_1(%arg0: i32) -> (i32, i32) {
    %c0_i32 = arith.constant 0 : i32
    %c0_i32_0 = arith.constant 0 : i32
    %c0_i32_1 = arith.constant 0 : i32
    return %c0_i32, %c0_i32_0 : i32, i32
  }
  func.func @transform_2(%arg0: i32) -> (i32, i32) {
    %c0_i32 = arith.constant 0 : i32
    %c0_i32_0 = arith.constant 0 : i32
    %c0_i32_1 = arith.constant 0 : i32
    return %c0_i32, %c0_i32_0 : i32, i32
  }
  func.func @transform_3(%arg0: i32) -> (i32, i32) {
    %c0_i32 = arith.constant 0 : i32
    %c0_i32_0 = arith.constant 0 : i32
    return %arg0, %c0_i32 : i32, i32
  }
}

</mosaic_0001>

<bundles_post_ra>
// kernel: tpu_custom_call.1
= control target key start
LH: loop header
LB: loop body
LE: loop exit
PB: predicated region body
PF: predicated region fallthrough
CT: control target
= control target key end

     0   :  { %v203_v0 = vmov 0.0|0.0   ;;  %vm41_vm0 = vcmask 261120   ;;  %v204_v41 = vmov 0   ;;  %v141_v54 = vlaneseq  ;;  %s305_s1 = inlined_call_operand.vmem [shape: f32[160,32], index: 1, kind: input, shape index: {}]   ;;  %s306_s0 = inlined_call_operand.vmem [shape: f32[8,160], index: 0, kind: input, shape index: {}]   ;;  %s307_s2 = inlined_call_operand.vmem [shape: f32[3,32], index: 2, kind: input, shape index: {}]   ;;  %s308_s3 = inlined_call_operand.vmem [shape: f32[8,2], index: 3, kind: output, shape index: {}]  }
   0x1   :  { %165 = vmatprep.subr.bf16.mxu0 %v203_v0  ;;  %v16_v1 = vld [vmem:[%s305_s1] sm:$0xff]  ;;  %v17_v2 = vld [vmem:[%s305_s1 + $0x8] sm:$0xff]  ;;  %v18_v3 = vld [vmem:[%s305_s1 + $0x10] sm:$0xff]  ;;  %198 = vset.pattern.permute.xlu1 %v204_v41  ;;  %vm155_vm3 = vcmask 15360  }
   0x2   :  { %v166_v4 = vpack.c.bf16 %v17_v2, %v16_v1  ;;  %v19_v5 = vld [vmem:[%s305_s1 + $0x18] sm:$0xff]  ;;  %v20_v7 = vld [vmem:[%s305_s1 + $0x20] sm:$0xff]  ;;  %v21_v8 = vld [vmem:[%s305_s1 + $0x28] sm:$0xff]  ;;  %197 = vset.pattern.permute.xlu0 %v204_v41  ;;  %v142_v55 = vand.u32 127, %v141_v54 }
   0x3   :  { %v169_v6 = vpack.c.bf16 %v19_v5, %v18_v3  ;;  %v15_v9 = vld [vmem:[%s306_s0 + $0x8] sm:$0xff]  ;;  %v172_v10 = vpack.c.bf16 %v21_v8, %v20_v7  ;;  %v22_v11 = vld [vmem:[%s305_s1 + $0x30] sm:$0xff]  ;;  %v23_v12 = vld [vmem:[%s305_s1 + $0x38] sm:$0xff] }
   0x4   :  { %167 = vmatpush1.bf16.msra.mxu0 %v166_v4  ;;  %162 = vmatprep.mubr.msk.f32.mxu0 %vm41_vm0, %v15_v9  ;;  %v175_v13 = vpack.c.bf16 %v23_v12, %v22_v11  ;;  %v24_v14 = vld [vmem:[%s305_s1 + $0x40] sm:$0xff]  ;;  %v25_v15 = vld [vmem:[%s305_s1 + $0x48] sm:$0xff]  ;;  %v26_v17 = vld [vmem:[%s305_s1 + $0x50] sm:$0xff]  ;;  %vm143_vm2 = vcmp.eq.s32.totalorder %v142_v55, 0 }
   0x5   :  { %168 = vmatprep.subr.bf16.mxu0 %v203_v0  ;;  %v178_v16 = vpack.c.bf16 %v25_v15, %v24_v14  ;;  %v27_v18 = vld [vmem:[%s305_s1 + $0x58] sm:$0xff]  ;;  %v28_v20 = vld [vmem:[%s305_s1 + $0x60] sm:$0xff]  ;;  %v29_v21 = vld [vmem:[%s305_s1 + $0x68] sm:$0xff] }
   0x6   :  { %v181_v19 = vpack.c.bf16 %v27_v18, %v26_v17  ;;  %v184_v22 = vpack.c.bf16 %v29_v21, %v28_v20  ;;  %v30_v23 = vld [vmem:[%s305_s1 + $0x70] sm:$0xff]  ;;  %v31_v24 = vld [vmem:[%s305_s1 + $0x78] sm:$0xff]  ;;  %v32_v26 = vld [vmem:[%s305_s1 + $0x80] sm:$0xff] }
   0x7   :  { %v187_v25 = vpack.c.bf16 %v31_v24, %v30_v23  ;;  %v33_v27 = vld [vmem:[%s305_s1 + $0x88] sm:$0xff]  ;;  %v34_v29 = vld [vmem:[%s305_s1 + $0x90] sm:$0xff]  ;;  %v35_v30 = vld [vmem:[%s305_s1 + $0x98] sm:$0xff] }
   0x8   :  { %170 = vmatpush1.bf16.msra.mxu0 %v169_v6  ;;  %v190_v28 = vpack.c.bf16 %v33_v27, %v32_v26  ;;  %v193_v31 = vpack.c.bf16 %v35_v30, %v34_v29  ;;  %v14_v32 = vld [vmem:[%s306_s0] sm:$0xff] }
   0x9   :  { %171 = vmatprep.subr.bf16.mxu0 %v203_v0  ;;  %v161_v33 = vld [vmem:[%s307_s2] ss:$0 sm:$0xff]  ;;  %v163_v37 = vld [vmem:[%s307_s2 + $0x1] ss:$0 sm:$0xff]  ;;  %v164_v42 = vld [vmem:[%s307_s2 + $0x2] ss:$0 sm:$0xff] }
   0xc   :  { %173 = vmatpush1.bf16.msra.mxu0 %v172_v10 }
   0xd   :  { %174 = vmatprep.subr.bf16.mxu0 %v203_v0 }
  0x10   :  { %176 = vmatpush1.bf16.msra.mxu0 %v175_v13 }
  0x11   :  { %177 = vmatprep.subr.bf16.mxu0 %v203_v0 }
  0x14   :  { %179 = vmatpush1.bf16.msra.mxu0 %v178_v16 }
  0x15   :  { %180 = vmatprep.subr.bf16.mxu0 %v203_v0 }
  0x18   :  { %182 = vmatpush1.bf16.msra.mxu0 %v181_v19 }
  0x19   :  { %183 = vmatprep.subr.bf16.mxu0 %v203_v0 }
  0x1c   :  { %185 = vmatpush1.bf16.msra.mxu0 %v184_v22 }
  0x1d   :  { %186 = vmatprep.subr.bf16.mxu0 %v203_v0 }
  0x20   :  { %188 = vmatpush1.bf16.msra.mxu0 %v187_v25 }
  0x21   :  { %189 = vmatprep.subr.bf16.mxu0 %v203_v0 }
  0x24   :  { %191 = vmatpush1.bf16.msra.mxu0 %v190_v28 }
  0x25   :  { %192 = vmatprep.subr.bf16.mxu0 %v203_v0 }
  0x28   :  { %194 = vmatpush1.bf16.msra.mxu0 %v193_v31 }
  0x2b   :  { %110 = vmatmul.mubr.f32.vlgmr.msra.gmra.mrb[0].mxu0 %v14_v32 }
  0xfe   :  { %v111_v34 = vpop.f32.mrb[0].mxu0 }
  0xff   :  { %v112_v35 = vadd.f32 %v161_v33, %v111_v34  ;;  %v113_v36 = vpop.f32.mrb[1].mxu0 }
 0x101   :  { %v115_v38 = vmax.f32 %v112_v35, 0.0 }
 0x103   :  { %v121_v39 = vmul.f32 %v163_v37, %v115_v38 }
 0x105   :  { %v122_v40 = vsel %vm41_vm0, %v121_v39, 0.0 }
 0x106   :  { %123 = vadd.xlane.f32.xlu0 %v122_v40 }
 0x193   :  { %v124_v43 = vpop.xlane.xlu0 %123 }
 0x194   :  { %v130_v44 = vadd.f32 %v164_v42, %v124_v43 }
 0x196   :  { %v131_v45 = vand.u32 2147483647, %v130_v44  ;;  %vm138_vm1 = vcmp.ge.f32.partialorder %v130_v44, 0.0 }
 0x198   :  { %v132_v46 = vsub.f32 0.0, %v131_v45 }
 0x19a   :  { %v133_v47 = vmul.f32 1.442695, %v132_v46 }
 0x19c   :  { %199 = vpow2.f32 %v133_v47 }
 0x1a6   :  { %v200_v48 = vpop.eup %199 }
 0x1a7   :  { %v135_v49 = vadd.f32 1.0, %v200_v48 }
 0x1a9   :  { %201 = vrcp.f32 %v135_v49 }
 0x1b3   :  { %v202_v50 = vpop.eup %201 }
 0x1b4   :  { %v137_v51 = vmul.f32 %v202_v50, %v200_v48 }
 0x1b6   :  { %v140_v52 = vsel %vm138_vm1, %v137_v51, %v202_v50  ;;  %v139_v53 = vsel %vm138_vm1, %v202_v50, %v137_v51 }
 0x1b7   :  { %151 = vperm.xlu1 %198, %v140_v52   ;;  %146 = vperm.xlu0 %197, %v139_v53  }
 0x236   :  { %v152_v56 = vpop.permute.xlu1 %151  ;;  %v147_v57 = vpop.permute.xlu0 %146 }
 0x237   :  { %v154_v58 = vsel %vm143_vm2, %v147_v57, %v152_v56 }
 0x238   :  { %156 = vst.msk [vmem:[%s308_s3] sm:$0xff] %vm155_vm3, %v154_v58 }

</bundles_post_ra>
